<compile_context>
chip_gen: v5e
topology: v5e:2x2
jax: 0.10.0
libtpu: 0.0.40
codegen_flags: <defaults>
</compile_context>

<pallas_src>
import functools

import jax
import jax.numpy as jnp
from jax.experimental import pallas as pl
from jax.experimental.pallas import tpu as pltpu


def _round_up(v: int, m: int) -> int:
    return ((v + m - 1) // m) * m


def _deep_svdd_kernel(x_ref, w1t_ref, b1_ref, w2t_ref, b2_ref, o_ref):
    """Fused MLP tile: o = tanh(x @ W1t + b1) @ W2t + b2 (f32 accumulation)."""
    # Cast the activation tile to the weights' compute dtype just before the
    # MXU; avoids a separate wrapper-side cast/pad pass over x in HBM.
    x = x_ref[...].astype(w1t_ref.dtype)
    h = jnp.dot(x, w1t_ref[...], preferred_element_type=jnp.float32)
    # Bias add + tanh in f32 (VPU + EUP); b1 is (1, Hp) and broadcasts.
    h = jnp.tanh(h + b1_ref[...])
    out = jnp.dot(h.astype(w2t_ref.dtype), w2t_ref[...],
                  preferred_element_type=jnp.float32)
    o_ref[...] = (out + b2_ref[...]).astype(o_ref.dtype)


def prepare_deep_svdd_params(w1, b1, w2, b2, *, compute_dtype=jnp.bfloat16):
    """One-time parameter prep (transpose, hidden-dim lane pad, dtype cast).

    Hoisted out of the per-call forward: weights are constant, so padding /
    transposing them on every call just adds small HBM round-trips.
    """
    H, D = w1.shape            # PyTorch Linear layout: (out_features, in_features)
    R = w2.shape[0]            # rep_dim = D // 4
    Hp = _round_up(H, 128)     # lane-pad hidden dim (exact: tanh(0)=0 columns)
    w1t = jnp.zeros((D, Hp), compute_dtype).at[:, :H].set(
        jnp.transpose(w1).astype(compute_dtype))
    w2t = jnp.zeros((Hp, R), compute_dtype).at[:H, :].set(
        jnp.transpose(w2).astype(compute_dtype))
    b1r = jnp.zeros((1, Hp), jnp.float32).at[:, :H].set(
        b1.astype(jnp.float32)[None, :])
    b2r = b2.astype(jnp.float32).reshape(1, R)
    return w1t, b1r, w2t, b2r


def _pick_block_b(B: int) -> int:
    """Batch tile: 1 grid step on single-TC chips, 2 even steps on 2-TC v7x."""
    kind = ""
    try:
        kind = jax.devices()[0].device_kind.lower()
    except Exception:
        pass
    two_tc = ("v7" in kind) or ("7x" in kind)
    steps = 2 if (two_tc and B >= 16) else 1
    bb = _round_up(-(-B // steps), 8)
    # VMEM budget ~1.5 KiB/row with double-buffering; cap far below the 32 MiB
    # default scoped limit (v7x) so this also scales to large batches safely.
    return max(8, min(bb, 8192))


def _is_v7x() -> bool:
    try:
        kind = jax.devices()[0].device_kind.lower()
        return ("v7" in kind) or ("7x" in kind)
    except Exception:
        return False


@functools.partial(jax.jit, static_argnames=("block_b",))
def deep_svdd_forward(x, w1t, b1r, w2t, b2r, *, block_b):
    """Forward pass of DeepSVDDModel on prepared (padded/transposed) params.

    Args:
      x   : (B, D) f32 batch (passed unpadded; cast to compute dtype in-kernel).
      w1t : (D, Hp) first Linear weight, transposed + lane-padded.
      b1r : (1, Hp) first Linear bias (f32, lane-padded).
      w2t : (Hp, R) second Linear weight, transposed + lane-padded rows.
      b2r : (1, R)  second Linear bias (f32).
      block_b: batch tile rows (static; multiple of 8).
    Returns:
      (B, R) f32 embedding, R = diameter // 4.
    """
    B, D = x.shape
    Hp = w1t.shape[1]
    R = w2t.shape[1]

    bb = max(8, min(_round_up(block_b, 8), _round_up(B, 8)))
    grid = (pl.cdiv(B, bb),)
    # NOTE: if B is not a multiple of bb, the final partial x block holds
    # unspecified rows; their outputs are masked on store (harmless).

    # Batch axis across both TensorCores on v7x; plain "parallel" elsewhere.
    sem = (pltpu.CORE_PARALLEL,) if (_is_v7x() and grid[0] >= 2) else ("parallel",)

    cost = pl.CostEstimate(
        flops=2 * B * (D * Hp + Hp * R),
        transcendentals=B * Hp,
        bytes_accessed=int(
            x.size * x.dtype.itemsize
            + w1t.size * w1t.dtype.itemsize
            + w2t.size * w2t.dtype.itemsize
            + (b1r.size + b2r.size) * 4
            + B * R * 4),
    )

    return pl.pallas_call(
        _deep_svdd_kernel,
        out_shape=jax.ShapeDtypeStruct((B, R), jnp.float32),
        grid_spec=pl.GridSpec(
            grid=grid,
            in_specs=[
                pl.BlockSpec((bb, D), lambda i: (i, 0)),    # x tile (streamed)
                pl.BlockSpec((D, Hp), lambda i: (0, 0)),    # W1^T (resident)
                pl.BlockSpec((1, Hp), lambda i: (0, 0)),    # b1
                pl.BlockSpec((Hp, R), lambda i: (0, 0)),    # W2^T (resident)
                pl.BlockSpec((1, R), lambda i: (0, 0)),     # b2
            ],
            out_specs=pl.BlockSpec((bb, R), lambda i: (i, 0)),
        ),
        compiler_params=pltpu.CompilerParams(dimension_semantics=sem),
        cost_estimate=cost,
    )(x, w1t, b1r, w2t, b2r)


def _reference_forward(x, w1, b1, w2, b2):
    """Pure-JAX reference matching torch.nn.Linear semantics (f32)."""
    h = jnp.tanh(x @ w1.T + b1)
    return h @ w2.T + b2


if __name__ == "__main__":
    # Module config: diameter D, rep_dim = D // 4.
    diameter = 128
    batch = 512

    D, H, R = diameter, diameter // 2, diameter // 4

    key = jax.random.PRNGKey(0)
    kx, kw1, kb1, kw2, kb2 = jax.random.split(key, 5)

    # Deterministic synthetic parameters (PyTorch Linear weight layout).
    x = jax.random.normal(kx, (batch, D), dtype=jnp.float32)
    w1 = jax.random.normal(kw1, (H, D), dtype=jnp.float32) * (1.0 / jnp.sqrt(D))
    b1 = jax.random.normal(kb1, (H,), dtype=jnp.float32) * 0.01
    w2 = jax.random.normal(kw2, (R, H), dtype=jnp.float32) * (1.0 / jnp.sqrt(H))
    b2 = jax.random.normal(kb2, (R,), dtype=jnp.float32) * 0.01

    ref = _reference_forward(x, w1, b1, w2, b2)
    bb = _pick_block_b(batch)

    # Exact f32 operand path: tight correctness gate.
    p_f32 = prepare_deep_svdd_params(w1, b1, w2, b2, compute_dtype=jnp.float32)
    out_f32 = jax.block_until_ready(deep_svdd_forward(x, *p_f32, block_b=bb))
    assert out_f32.shape == (batch, R), out_f32.shape
    assert jnp.allclose(out_f32, ref, atol=1e-4, rtol=1e-4), (
        float(jnp.max(jnp.abs(out_f32 - ref))))

    # Default bf16 operand path (f32 accumulation); expected abs error ~1e-2
    # vs. the f32 reference, gate at 1e-1.
    p_bf16 = prepare_deep_svdd_params(w1, b1, w2, b2)
    out_bf16 = jax.block_until_ready(deep_svdd_forward(x, *p_bf16, block_b=bb))
    assert out_bf16.shape == (batch, R), out_bf16.shape
    bf16_err = float(jnp.max(jnp.abs(out_bf16 - ref)))
    assert bf16_err < 1e-1, bf16_err

    print("KERNEL_OK")
</pallas_src>

<mosaic_0001>
module attributes {stable_mosaic.version = 11 : i64} {
  func.func @_deep_svdd_kernel(%arg0: i32, %arg1: memref<512x128xf32, #tpu.memory_space<vmem>>, %arg2: memref<128x128xf32, #tpu.memory_space<vmem>>, %arg3: memref<1x128xf32, #tpu.memory_space<vmem>>, %arg4: memref<128x32xf32, #tpu.memory_space<vmem>>, %arg5: memref<1x32xf32, #tpu.memory_space<vmem>>, %arg6: memref<512x32xf32, #tpu.memory_space<vmem>>) attributes {dimension_semantics = [#tpu.dimension_semantics<parallel>], iteration_bounds = array<i64: 1>, scalar_prefetch = 0 : i64, scratch_operands = 0 : i64, tpu.core_type = #tpu.core_type<tc>, window_params = [{transform_indices = @transform_0, window_bounds = array<i64: 512, 128>}, {pipeline_mode = #tpu.pipeline_mode<synchronous>, transform_indices = @transform_1, window_bounds = array<i64: 128, 128>}, {pipeline_mode = #tpu.pipeline_mode<synchronous>, transform_indices = @transform_2, window_bounds = array<i64: 1, 128>}, {pipeline_mode = #tpu.pipeline_mode<synchronous>, transform_indices = @transform_3, window_bounds = array<i64: 128, 32>}, {pipeline_mode = #tpu.pipeline_mode<synchronous>, transform_indices = @transform_4, window_bounds = array<i64: 1, 32>}, {transform_indices = @transform_5, window_bounds = array<i64: 512, 32>}]} {
    %c0 = arith.constant 0 : index
    %c0_0 = arith.constant 0 : index
    %0 = vector.load %arg1[%c0, %c0_0] : memref<512x128xf32, #tpu.memory_space<vmem>>, vector<512x128xf32>
    %c0_1 = arith.constant 0 : index
    %c0_2 = arith.constant 0 : index
    %1 = vector.load %arg2[%c0_1, %c0_2] : memref<128x128xf32, #tpu.memory_space<vmem>>, vector<128x128xf32>
    %cst = arith.constant dense<0.000000e+00> : vector<512x128xf32>
    %2 = tpu.matmul %0, %1, %cst {dimension_numbers = #tpu.dot_dimension_numbers<[1], [0], [0], [1], [0, 0, 1, 1], [], []>} : vector<512x128xf32>, vector<128x128xf32>, vector<512x128xf32> -> vector<512x128xf32>
    %c0_3 = arith.constant 0 : index
    %c0_4 = arith.constant 0 : index
    %3 = vector.load %arg3[%c0_3, %c0_4] : memref<1x128xf32, #tpu.memory_space<vmem>>, vector<1x128xf32>
    %4 = vector.broadcast %3 : vector<1x128xf32> to vector<512x128xf32>
    %5 = arith.addf %2, %4 : vector<512x128xf32>
    %6 = math.tanh %5 : vector<512x128xf32>
    %c0_5 = arith.constant 0 : index
    %c0_6 = arith.constant 0 : index
    %7 = vector.load %arg4[%c0_5, %c0_6] : memref<128x32xf32, #tpu.memory_space<vmem>>, vector<128x32xf32>
    %cst_7 = arith.constant dense<0.000000e+00> : vector<512x32xf32>
    %8 = tpu.matmul %6, %7, %cst_7 {dimension_numbers = #tpu.dot_dimension_numbers<[1], [0], [0], [1], [0, 0, 1, 1], [], []>} : vector<512x128xf32>, vector<128x32xf32>, vector<512x32xf32> -> vector<512x32xf32>
    %c0_8 = arith.constant 0 : index
    %c0_9 = arith.constant 0 : index
    %9 = vector.load %arg5[%c0_8, %c0_9] : memref<1x32xf32, #tpu.memory_space<vmem>>, vector<1x32xf32>
    %10 = vector.broadcast %9 : vector<1x32xf32> to vector<512x32xf32>
    %11 = arith.addf %8, %10 : vector<512x32xf32>
    %c0_10 = arith.constant 0 : index
    %c0_11 = arith.constant 0 : index
    %12 = vector.load %arg6[%c0_10, %c0_11] : memref<512x32xf32, #tpu.memory_space<vmem>>, vector<512x32xf32>
    tpu.vector_store %arg6[%c0_10, %c0_11], %11 {strides = array<i32>} : memref<512x32xf32, #tpu.memory_space<vmem>>, vector<512x32xf32>,
    return
  }
  func.func @transform_0(%arg0: i32) -> (i32, i32) {
    %c0_i32 = arith.constant 0 : i32
    %c0_i32_0 = arith.constant 0 : i32
    return %arg0, %c0_i32 : i32, i32
  }
  func.func @transform_1(%arg0: i32) -> (i32, i32) {
    %c0_i32 = arith.constant 0 : i32
    %c0_i32_0 = arith.constant 0 : i32
    %c0_i32_1 = arith.constant 0 : i32
    return %c0_i32, %c0_i32_0 : i32, i32
  }
  func.func @transform_2(%arg0: i32) -> (i32, i32) {
    %c0_i32 = arith.constant 0 : i32
    %c0_i32_0 = arith.constant 0 : i32
    %c0_i32_1 = arith.constant 0 : i32
    return %c0_i32, %c0_i32_0 : i32, i32
  }
  func.func @transform_3(%arg0: i32) -> (i32, i32) {
    %c0_i32 = arith.constant 0 : i32
    %c0_i32_0 = arith.constant 0 : i32
    %c0_i32_1 = arith.constant 0 : i32
    return %c0_i32, %c0_i32_0 : i32, i32
  }
  func.func @transform_4(%arg0: i32) -> (i32, i32) {
    %c0_i32 = arith.constant 0 : i32
    %c0_i32_0 = arith.constant 0 : i32
    %c0_i32_1 = arith.constant 0 : i32
    return %c0_i32, %c0_i32_0 : i32, i32
  }
  func.func @transform_5(%arg0: i32) -> (i32, i32) {
    %c0_i32 = arith.constant 0 : i32
    %c0_i32_0 = arith.constant 0 : i32
    return %arg0, %c0_i32 : i32, i32
  }
}

</mosaic_0001>

<bundles_post_ra>
// kernel: deep_svdd_forward.1
= control target key start
LH: loop header
LB: loop body
LE: loop exit
PB: predicated region body
PF: predicated region fallthrough
CT: control target
= control target key end

     0   :  { %10 = vsyncpa [#allocation3], 0  ;;  %s883_s21 = smov [#allocation2]   ;;  %s884_s23 = smov 128   ;;  %s1409_s0 = inlined_call_operand.hbm [shape: f32[512,128], index: 0, kind: input, shape index: {}]   ;;  %s1410_s1 = inlined_call_operand.vmem [shape: f32[128,128], index: 1, kind: input, shape index: {}]   ;;  %s1411_s2 = inlined_call_operand.vmem [shape: f32[1,128], index: 2, kind: input, shape index: {}]   ;;  %s1412_s3 = inlined_call_operand.vmem [shape: f32[128,32], index: 3, kind: input, shape index: {}]   ;;  %s1413_s4 = inlined_call_operand.vmem [shape: f32[1,32], index: 4, kind: input, shape index: {}]   ;;  %s1414_s5 = inlined_call_operand.vmem [shape: f32[512,32], index: 5, kind: output, shape index: {}]  }
   0x1   :  { %s15_s20 = sshll.u32 %s1409_s0, 4  ;;  %s17_s22 = sshll.u32 %s883_s21, 4  ;;  %s16_s20 = int_to_ptr.hbm [resolvable:$true] %s15_s20  ;;  %s18_s22 = int_to_ptr.vmem [resolvable:$true] %s17_s22 }
   0x2   :  { %s885_s24 = smov 8  }
   0x3   :  { %23 = dma.hbm_to_vmem [thread:$0]  %s16_s20, 8192, %s18_s22, [#allocation3], %s884_s23, %s884_s23, %s885_s24  }
   0x4   :  { %881 = dma.done.wait [#allocation3], 8192  }
   0x5   :  { %882 = vsyncadd [#allocation3], 4294959104  ;;  %v115_v0 = vld [vmem:[%s1410_s1 + $0x78] sm:$0xff]  ;;  %v114_v1 = vld [vmem:[%s1410_s1 + $0x70] sm:$0xff]  ;;  %vm622_vm0 = vcmask 261120  }
   0x6   :  { %692 = vmatpush.msra.mxu2 %v115_v0  ;;  %120 = vmatpush.msra.mxu0 %v115_v0  ;;  %v113_v2 = vld [vmem:[%s1410_s1 + $0x68] sm:$0xff]  ;;  %v112_v3 = vld [vmem:[%s1410_s1 + $0x60] sm:$0xff]  ;;  %v111_v4 = vld [vmem:[%s1410_s1 + $0x58] sm:$0xff] }
   0x7   :  { %v110_v5 = vld [vmem:[%s1410_s1 + $0x50] sm:$0xff]  ;;  %v109_v6 = vld [vmem:[%s1410_s1 + $0x48] sm:$0xff]  ;;  %v108_v7 = vld [vmem:[%s1410_s1 + $0x40] sm:$0xff] }
   0x8   :  { %693 = vmatpush.msra.mxu2 %v114_v1  ;;  %121 = vmatpush.msra.mxu0 %v114_v1  ;;  %v107_v8 = vld [vmem:[%s1410_s1 + $0x38] sm:$0xff]  ;;  %v106_v9 = vld [vmem:[%s1410_s1 + $0x30] sm:$0xff]  ;;  %v105_v10 = vld [vmem:[%s1410_s1 + $0x28] sm:$0xff] }
   0x9   :  { %v104_v11 = vld [vmem:[%s1410_s1 + $0x20] sm:$0xff]  ;;  %v103_v12 = vld [vmem:[%s1410_s1 + $0x18] sm:$0xff]  ;;  %v102_v13 = vld [vmem:[%s1410_s1 + $0x10] sm:$0xff] }
   0xa   :  { %694 = vmatpush.msra.mxu2 %v113_v2  ;;  %122 = vmatpush.msra.mxu0 %v113_v2  ;;  %v101_v14 = vld [vmem:[%s1410_s1 + $0x8] sm:$0xff]  ;;  %v100_v15 = vld [vmem:[%s1410_s1] sm:$0xff]  ;;  %v70_v20 = vld [vmem:[#allocation2 + $0x110] sm:$0xff] }
   0xb   :  { %v68_v16 = vld [vmem:[#allocation2 + $0x100] sm:$0xff]  ;;  %v69_v18 = vld [vmem:[#allocation2 + $0x108] sm:$0xff]  ;;  %v38_v21 = vld [vmem:[#allocation2 + $0x10] sm:$0xff] }
   0xc   :  { %695 = vmatpush.msra.mxu2 %v112_v3  ;;  %123 = vmatpush.msra.mxu0 %v112_v3  ;;  %v36_v17 = vld [vmem:[#allocation2] sm:$0xff]  ;;  %v37_v19 = vld [vmem:[#allocation2 + $0x8] sm:$0xff]  ;;  %v71_v22 = vld [vmem:[#allocation2 + $0x118] sm:$0xff] }
   0xd   :  { %v39_v23 = vld [vmem:[#allocation2 + $0x18] sm:$0xff]  ;;  %v72_v24 = vld [vmem:[#allocation2 + $0x120] sm:$0xff]  ;;  %v73_v26 = vld [vmem:[#allocation2 + $0x128] sm:$0xff] }
   0xe   :  { %696 = vmatpush.msra.mxu2 %v111_v4  ;;  %124 = vmatpush.msra.mxu0 %v111_v4  ;;  %v40_v25 = vld [vmem:[#allocation2 + $0x20] sm:$0xff]  ;;  %v41_v27 = vld [vmem:[#allocation2 + $0x28] sm:$0xff]  ;;  %v74_v28 = vld [vmem:[#allocation2 + $0x130] sm:$0xff] }
   0xf   :  { %v42_v29 = vld [vmem:[#allocation2 + $0x30] sm:$0xff]  ;;  %v75_v30 = vld [vmem:[#allocation2 + $0x138] sm:$0xff]  ;;  %v76_v32 = vld [vmem:[#allocation2 + $0x140] sm:$0xff] }
  0x10   :  { %697 = vmatpush.msra.mxu2 %v110_v5  ;;  %125 = vmatpush.msra.mxu0 %v110_v5  ;;  %v43_v31 = vld [vmem:[#allocation2 + $0x38] sm:$0xff]  ;;  %v44_v33 = vld [vmem:[#allocation2 + $0x40] sm:$0xff]  ;;  %v77_v34 = vld [vmem:[#allocation2 + $0x148] sm:$0xff] }
  0x11   :  { %v45_v35 = vld [vmem:[#allocation2 + $0x48] sm:$0xff]  ;;  %v408_v36 = vld [vmem:[%s1412_s3 + $0x78] sm:$0xff]  ;;  %v78_v37 = vld [vmem:[#allocation2 + $0x150] sm:$0xff] }
  0x12   :  { %698 = vmatpush.msra.mxu2 %v109_v6  ;;  %126 = vmatpush.msra.mxu0 %v109_v6  ;;  %v46_v38 = vld [vmem:[#allocation2 + $0x50] sm:$0xff]  ;;  %v406_v40 = vld [vmem:[%s1412_s3 + $0x68] sm:$0xff]  ;;  %v405_v41 = vld [vmem:[%s1412_s3 + $0x60] sm:$0xff] }
  0x13   :  { %708 = vmatpush.msra.mxu3 %v408_v36  ;;  %413 = vmatpush.msra.mxu1 %v408_v36  ;;  %v407_v39 = vld [vmem:[%s1412_s3 + $0x70] sm:$0xff]  ;;  %v404_v42 = vld [vmem:[%s1412_s3 + $0x58] sm:$0xff]  ;;  %v402_v46 = vld [vmem:[%s1412_s3 + $0x48] sm:$0xff] }
  0x14   :  { %699 = vmatpush.msra.mxu2 %v108_v7  ;;  %127 = vmatpush.msra.mxu0 %v108_v7  ;;  %v79_v43 = vld [vmem:[#allocation2 + $0x158] sm:$0xff]  ;;  %v403_v45 = vld [vmem:[%s1412_s3 + $0x50] sm:$0xff]  ;;  %v401_v47 = vld [vmem:[%s1412_s3 + $0x40] sm:$0xff] }
  0x15   :  { %709 = vmatpush.msra.mxu3 %v407_v39  ;;  %414 = vmatpush.msra.mxu1 %v407_v39  ;;  %v47_v44 = vld [vmem:[#allocation2 + $0x58] sm:$0xff]  ;;  %v80_v49 = vld [vmem:[#allocation2 + $0x160] sm:$0xff]  ;;  %v399_v51 = vld [vmem:[%s1412_s3 + $0x30] sm:$0xff] }
  0x16   :  { %700 = vmatpush.msra.mxu2 %v107_v8  ;;  %128 = vmatpush.msra.mxu0 %v107_v8  ;;  %v400_v48 = vld [vmem:[%s1412_s3 + $0x38] sm:$0xff]  ;;  %v48_v50 = vld [vmem:[#allocation2 + $0x60] sm:$0xff]  ;;  %v398_v52 = vld [vmem:[%s1412_s3 + $0x28] sm:$0xff] }
  0x17   :  { %710 = vmatpush.msra.mxu3 %v406_v40  ;;  %415 = vmatpush.msra.mxu1 %v406_v40  ;;  %v397_v53 = vld [vmem:[%s1412_s3 + $0x20] sm:$0xff]  ;;  %v81_v54 = vld [vmem:[#allocation2 + $0x168] sm:$0xff]  ;;  %v396_v56 = vld [vmem:[%s1412_s3 + $0x18] sm:$0xff] }
  0x18   :  { %701 = vmatpush.msra.mxu2 %v106_v9  ;;  %129 = vmatpush.msra.mxu0 %v106_v9  ;;  %v49_v55 = vld [vmem:[#allocation2 + $0x68] sm:$0xff]  ;;  %v395_v57 = vld [vmem:[%s1412_s3 + $0x10] sm:$0xff]  ;;  %v393_v59 = vld [vmem:[%s1412_s3] sm:$0xff] }
  0x19   :  { %711 = vmatpush.msra.mxu3 %v405_v41  ;;  %416 = vmatpush.msra.mxu1 %v405_v41  ;;  %v394_v58 = vld [vmem:[%s1412_s3 + $0x8] sm:$0xff]  ;;  %v82_v60 = vld [vmem:[#allocation2 + $0x170] sm:$0xff]  ;;  %v83_v62 = vld [vmem:[#allocation2 + $0x178] sm:$0xff] }
  0x1a   :  { %702 = vmatpush.msra.mxu2 %v105_v10  ;;  %130 = vmatpush.msra.mxu0 %v105_v10  ;;  %v50_v61 = vld [vmem:[#allocation2 + $0x70] sm:$0xff]  ;;  %v51_v63 = vld [vmem:[#allocation2 + $0x78] sm:$0xff]  ;;  %v1018_v0 = vld [vmem:[%s1411_s2] ss:$0 sm:$0xff] }
  0x1b   :  { %712 = vmatpush.msra.mxu3 %v404_v42  ;;  %417 = vmatpush.msra.mxu1 %v404_v42  ;;  %v84_v1 = vld [vmem:[#allocation2 + $0x180] sm:$0xff]  ;;  %v85_v7 = vld [vmem:[#allocation2 + $0x188] sm:$0xff] }
  0x1c   :  { %703 = vmatpush.msra.mxu2 %v104_v11  ;;  %131 = vmatpush.msra.mxu0 %v104_v11  ;;  %v52_v3 = vld [vmem:[#allocation2 + $0x80] sm:$0xff]  ;;  %v53_v9 = vld [vmem:[#allocation2 + $0x88] sm:$0xff] }
  0x1d   :  { %713 = vmatpush.msra.mxu3 %v403_v45  ;;  %418 = vmatpush.msra.mxu1 %v403_v45  ;;  %v89_v39 = vld [vmem:[#allocation2 + $0x1a8] sm:$0xff] }
  0x1e   :  { %704 = vmatpush.msra.mxu2 %v103_v12  ;;  %132 = vmatpush.msra.mxu0 %v103_v12  ;;  %v57_v41 = vld [vmem:[#allocation2 + $0xa8] sm:$0xff] }
  0x1f   :  { %714 = vmatpush.msra.mxu3 %v402_v46  ;;  %419 = vmatpush.msra.mxu1 %v402_v46 }
  0x20   :  { %705 = vmatpush.msra.mxu2 %v102_v13  ;;  %133 = vmatpush.msra.mxu0 %v102_v13 }
  0x21   :  { %715 = vmatpush.msra.mxu3 %v401_v47  ;;  %420 = vmatpush.msra.mxu1 %v401_v47  ;;  %v90_v47 = vld [vmem:[#allocation2 + $0x1b0] sm:$0xff] }
  0x22   :  { %706 = vmatpush.msra.mxu2 %v101_v14  ;;  %134 = vmatpush.msra.mxu0 %v101_v14 }
  0x23   :  { %716 = vmatpush.msra.mxu3 %v400_v48  ;;  %421 = vmatpush.msra.mxu1 %v400_v48 }
  0x24   :  { %707 = vmatpush.msra.mxu2 %v100_v15  ;;  %135 = vmatpush.msra.mxu0 %v100_v15  ;;  %v86_v15 = vld [vmem:[#allocation2 + $0x190] sm:$0xff] }
  0x25   :  { %232 = vmatmul.f32.vlgmr.msra.gmra.mxu2 %v68_v16  ;;  %136 = vmatmul.f32.vlgmr.msra.gmra.mxu0 %v36_v17  ;;  %v54_v17 = vld [vmem:[#allocation2 + $0x90] sm:$0xff] }
  0x26   :  { %717 = vmatpush.msra.mxu3 %v399_v51  ;;  %422 = vmatpush.msra.mxu1 %v399_v51 }
  0x28   :  { %718 = vmatpush.msra.mxu3 %v398_v52  ;;  %423 = vmatpush.msra.mxu1 %v398_v52 }
  0x2a   :  { %719 = vmatpush.msra.mxu3 %v397_v53  ;;  %424 = vmatpush.msra.mxu1 %v397_v53 }
  0x2c   :  { %720 = vmatpush.msra.mxu3 %v396_v56  ;;  %425 = vmatpush.msra.mxu1 %v396_v56 }
  0x2d   :  { %235 = vmatmul.f32.gmra.mxu2 %v69_v18  ;;  %139 = vmatmul.f32.gmra.mxu0 %v37_v19 }
  0x2e   :  { %721 = vmatpush.msra.mxu3 %v395_v57  ;;  %426 = vmatpush.msra.mxu1 %v395_v57  ;;  %v59_v57 = vld [vmem:[#allocation2 + $0xb8] sm:$0xff] }
  0x30   :  { %722 = vmatpush.msra.mxu3 %v394_v58  ;;  %427 = vmatpush.msra.mxu1 %v394_v58 }
  0x32   :  { %723 = vmatpush.msra.mxu3 %v393_v59  ;;  %428 = vmatpush.msra.mxu1 %v393_v59 }
  0x35   :  { %238 = vmatmul.f32.gmra.mxu2 %v70_v20  ;;  %142 = vmatmul.f32.gmra.mxu0 %v38_v21 }
  0x3d   :  { %241 = vmatmul.f32.gmra.mxu2 %v71_v22  ;;  %145 = vmatmul.f32.gmra.mxu0 %v39_v23  ;;  %v87_v23 = vld [vmem:[#allocation2 + $0x198] sm:$0xff] }
  0x45   :  { %244 = vmatmul.f32.gmra.mxu2 %v72_v24  ;;  %148 = vmatmul.f32.gmra.mxu0 %v40_v25  ;;  %v55_v25 = vld [vmem:[#allocation2 + $0x98] sm:$0xff] }
  0x4d   :  { %247 = vmatmul.f32.gmra.mxu2 %v73_v26  ;;  %151 = vmatmul.f32.gmra.mxu0 %v41_v27 }
  0x55   :  { %250 = vmatmul.f32.gmra.mxu2 %v74_v28  ;;  %154 = vmatmul.f32.gmra.mxu0 %v42_v29 }
  0x5d   :  { %253 = vmatmul.f32.gmra.mxu2 %v75_v30  ;;  %157 = vmatmul.f32.gmra.mxu0 %v43_v31  ;;  %v88_v31 = vld [vmem:[#allocation2 + $0x1a0] sm:$0xff] }
  0x65   :  { %256 = vmatmul.f32.gmra.mxu2 %v76_v32  ;;  %160 = vmatmul.f32.gmra.mxu0 %v44_v33  ;;  %v56_v33 = vld [vmem:[#allocation2 + $0xa0] sm:$0xff] }
  0x6d   :  { %259 = vmatmul.f32.gmra.mxu2 %v77_v34  ;;  %163 = vmatmul.f32.gmra.mxu0 %v45_v35 }
  0x75   :  { %262 = vmatmul.f32.gmra.mxu2 %v78_v37  ;;  %166 = vmatmul.f32.gmra.mxu0 %v46_v38 }
  0x7d   :  { %265 = vmatmul.f32.gmra.mxu2 %v79_v43  ;;  %169 = vmatmul.f32.gmra.mxu0 %v47_v44 }
  0x85   :  { %268 = vmatmul.f32.gmra.mxu2 %v80_v49  ;;  %172 = vmatmul.f32.gmra.mxu0 %v48_v50  ;;  %v58_v49 = vld [vmem:[#allocation2 + $0xb0] sm:$0xff] }
  0x8d   :  { %271 = vmatmul.f32.gmra.mxu2 %v81_v54  ;;  %175 = vmatmul.f32.gmra.mxu0 %v49_v55  ;;  %v91_v55 = vld [vmem:[#allocation2 + $0x1b8] sm:$0xff] }
  0x95   :  { %274 = vmatmul.f32.gmra.mxu2 %v82_v60  ;;  %178 = vmatmul.f32.gmra.mxu0 %v50_v61 }
  0x9d   :  { %277 = vmatmul.f32.gmra.mxu2 %v83_v62  ;;  %181 = vmatmul.f32.gmra.mxu0 %v51_v63  ;;  %v92_v63 = vld [vmem:[#allocation2 + $0x1c0] sm:$0xff] }
  0xa2   :  { %v137_v2 = vpop.f32.mrf.mxu0 }
  0xa3   :  { %v138_v4 = vadd.f32 %v1018_v0, %v137_v2  ;;  %v60_v2 = vld [vmem:[#allocation2 + $0xc0] sm:$0xff] }
  0xa5   :  { %280 = vmatmul.f32.gmra.mxu2 %v84_v1  ;;  %729 = vtanh.f32 %v138_v4  ;;  %184 = vmatmul.f32.gmra.mxu0 %v52_v3 }
  0xa8   :  { %v233_v5 = vpop.f32.mrf.mxu2 }
  0xa9   :  { %v234_v6 = vadd.f32 %v1018_v0, %v233_v5 }
  0xaa   :  { %v140_v8 = vpop.f32.mrf.mxu0 }
  0xab   :  { %v730_v10 = vpop.eup %729  ;;  %731 = vtanh.f32 %v234_v6  ;;  %v141_v11 = vadd.f32 %v1018_v0, %v140_v8  ;;  %v93_v8 = vld [vmem:[#allocation2 + $0x1c8] sm:$0xff] }
  0xac   :  { %429 = vmatmul.f32.vlgmr.msra.gmra.mxu1 %v730_v10  ;;  %v61_v10 = vld [vmem:[#allocation2 + $0xc8] sm:$0xff] }
  0xad   :  { %283 = vmatmul.f32.gmra.mxu2 %v85_v7  ;;  %733 = vtanh.f32 %v141_v11  ;;  %187 = vmatmul.f32.gmra.mxu0 %v53_v9 }
  0xb0   :  { %v236_v12 = vpop.f32.mrf.mxu2 }
  0xb1   :  { %v732_v13 = vpop.eup %731  ;;  %v237_v14 = vadd.f32 %v1018_v0, %v236_v12 }
  0xb2   :  { %525 = vmatmul.f32.vlgmr.msra.gmra.mxu3 %v732_v13  ;;  %v143_v16 = vpop.f32.mrf.mxu0 }
  0xb3   :  { %v734_v18 = vpop.eup %733  ;;  %735 = vtanh.f32 %v237_v14  ;;  %v144_v19 = vadd.f32 %v1018_v0, %v143_v16  ;;  %v94_v16 = vld [vmem:[#allocation2 + $0x1d0] sm:$0xff] }
  0xb4   :  { %432 = vmatmul.f32.gmra.mxu1 %v734_v18  ;;  %v62_v18 = vld [vmem:[#allocation2 + $0xd0] sm:$0xff] }
  0xb5   :  { %286 = vmatmul.f32.gmra.mxu2 %v86_v15  ;;  %737 = vtanh.f32 %v144_v19  ;;  %190 = vmatmul.f32.gmra.mxu0 %v54_v17 }
  0xb8   :  { %v239_v20 = vpop.f32.mrf.mxu2 }
  0xb9   :  { %v736_v21 = vpop.eup %735  ;;  %v240_v22 = vadd.f32 %v1018_v0, %v239_v20 }
  0xba   :  { %528 = vmatmul.f32.gmra.mxu3 %v736_v21  ;;  %v146_v24 = vpop.f32.mrf.mxu0 }
  0xbb   :  { %v738_v26 = vpop.eup %737  ;;  %739 = vtanh.f32 %v240_v22  ;;  %v147_v27 = vadd.f32 %v1018_v0, %v146_v24  ;;  %v95_v24 = vld [vmem:[#allocation2 + $0x1d8] sm:$0xff] }
  0xbc   :  { %435 = vmatmul.f32.gmra.mxu1 %v738_v26  ;;  %v63_v26 = vld [vmem:[#allocation2 + $0xd8] sm:$0xff] }
  0xbd   :  { %289 = vmatmul.f32.gmra.mxu2 %v87_v23  ;;  %741 = vtanh.f32 %v147_v27  ;;  %193 = vmatmul.f32.gmra.mxu0 %v55_v25 }
  0xc0   :  { %v242_v28 = vpop.f32.mrf.mxu2 }
  0xc1   :  { %v740_v29 = vpop.eup %739  ;;  %v243_v30 = vadd.f32 %v1018_v0, %v242_v28 }
  0xc2   :  { %531 = vmatmul.f32.gmra.mxu3 %v740_v29  ;;  %v149_v32 = vpop.f32.mrf.mxu0 }
  0xc3   :  { %v742_v34 = vpop.eup %741  ;;  %743 = vtanh.f32 %v243_v30  ;;  %v150_v35 = vadd.f32 %v1018_v0, %v149_v32  ;;  %v96_v32 = vld [vmem:[#allocation2 + $0x1e0] sm:$0xff] }
  0xc4   :  { %438 = vmatmul.f32.gmra.mxu1 %v742_v34  ;;  %v64_v34 = vld [vmem:[#allocation2 + $0xe0] sm:$0xff] }
  0xc5   :  { %292 = vmatmul.f32.gmra.mxu2 %v88_v31  ;;  %745 = vtanh.f32 %v150_v35  ;;  %196 = vmatmul.f32.gmra.mxu0 %v56_v33 }
  0xc8   :  { %v245_v36 = vpop.f32.mrf.mxu2 }
  0xc9   :  { %v744_v37 = vpop.eup %743  ;;  %v246_v38 = vadd.f32 %v1018_v0, %v245_v36 }
  0xca   :  { %534 = vmatmul.f32.gmra.mxu3 %v744_v37  ;;  %v152_v40 = vpop.f32.mrf.mxu0 }
  0xcb   :  { %v746_v42 = vpop.eup %745  ;;  %747 = vtanh.f32 %v246_v38  ;;  %v153_v43 = vadd.f32 %v1018_v0, %v152_v40  ;;  %v97_v40 = vld [vmem:[#allocation2 + $0x1e8] sm:$0xff] }
  0xcc   :  { %441 = vmatmul.f32.gmra.mxu1 %v746_v42  ;;  %v65_v42 = vld [vmem:[#allocation2 + $0xe8] sm:$0xff] }
  0xcd   :  { %295 = vmatmul.f32.gmra.mxu2 %v89_v39  ;;  %749 = vtanh.f32 %v153_v43  ;;  %199 = vmatmul.f32.gmra.mxu0 %v57_v41 }
  0xd0   :  { %v248_v44 = vpop.f32.mrf.mxu2 }
  0xd1   :  { %v748_v45 = vpop.eup %747  ;;  %v249_v46 = vadd.f32 %v1018_v0, %v248_v44 }
  0xd2   :  { %537 = vmatmul.f32.gmra.mxu3 %v748_v45  ;;  %v155_v48 = vpop.f32.mrf.mxu0 }
  0xd3   :  { %v750_v50 = vpop.eup %749  ;;  %751 = vtanh.f32 %v249_v46  ;;  %v156_v51 = vadd.f32 %v1018_v0, %v155_v48  ;;  %v98_v48 = vld [vmem:[#allocation2 + $0x1f0] sm:$0xff] }
  0xd4   :  { %444 = vmatmul.f32.gmra.mxu1 %v750_v50  ;;  %v66_v50 = vld [vmem:[#allocation2 + $0xf0] sm:$0xff] }
  0xd5   :  { %298 = vmatmul.f32.gmra.mxu2 %v90_v47  ;;  %753 = vtanh.f32 %v156_v51  ;;  %202 = vmatmul.f32.gmra.mxu0 %v58_v49 }
  0xd8   :  { %v251_v52 = vpop.f32.mrf.mxu2 }
  0xd9   :  { %v752_v53 = vpop.eup %751  ;;  %v252_v54 = vadd.f32 %v1018_v0, %v251_v52 }
  0xda   :  { %540 = vmatmul.f32.gmra.mxu3 %v752_v53  ;;  %v158_v56 = vpop.f32.mrf.mxu0 }
  0xdb   :  { %v754_v58 = vpop.eup %753  ;;  %755 = vtanh.f32 %v252_v54  ;;  %v159_v59 = vadd.f32 %v1018_v0, %v158_v56  ;;  %v99_v56 = vld [vmem:[#allocation2 + $0x1f8] sm:$0xff] }
  0xdc   :  { %447 = vmatmul.f32.gmra.mxu1 %v754_v58  ;;  %v67_v58 = vld [vmem:[#allocation2 + $0xf8] sm:$0xff] }
  0xdd   :  { %301 = vmatmul.f32.gmra.mxu2 %v91_v55  ;;  %757 = vtanh.f32 %v159_v59  ;;  %205 = vmatmul.f32.gmra.mxu0 %v59_v57 }
  0xe0   :  { %v254_v60 = vpop.f32.mrf.mxu2 }
  0xe1   :  { %v756_v61 = vpop.eup %755  ;;  %v255_v62 = vadd.f32 %v1018_v0, %v254_v60 }
  0xe2   :  { %543 = vmatmul.f32.gmra.mxu3 %v756_v61  ;;  %v161_v1 = vpop.f32.mrf.mxu0 }
  0xe3   :  { %v758_v3 = vpop.eup %757  ;;  %759 = vtanh.f32 %v255_v62  ;;  %v162_v4 = vadd.f32 %v1018_v0, %v161_v1 }
  0xe4   :  { %450 = vmatmul.f32.gmra.mxu1 %v758_v3 }
  0xe5   :  { %304 = vmatmul.f32.gmra.mxu2 %v92_v63  ;;  %761 = vtanh.f32 %v162_v4  ;;  %208 = vmatmul.f32.gmra.mxu0 %v60_v2  ;;  %v1056_v4 = vld [vmem:[%s1413_s4] ss:$0 sm:$0xff] }
  0xe8   :  { %v257_v5 = vpop.f32.mrf.mxu2 }
  0xe9   :  { %v760_v6 = vpop.eup %759  ;;  %v258_v7 = vadd.f32 %v1018_v0, %v257_v5 }
  0xea   :  { %546 = vmatmul.f32.gmra.mxu3 %v760_v6  ;;  %v164_v9 = vpop.f32.mrf.mxu0 }
  0xeb   :  { %v762_v11 = vpop.eup %761  ;;  %763 = vtanh.f32 %v258_v7  ;;  %v165_v12 = vadd.f32 %v1018_v0, %v164_v9 }
  0xec   :  { %453 = vmatmul.f32.gmra.mxu1 %v762_v11 }
  0xed   :  { %307 = vmatmul.f32.gmra.mxu2 %v93_v8  ;;  %765 = vtanh.f32 %v165_v12  ;;  %211 = vmatmul.f32.gmra.mxu0 %v61_v10 }
  0xf0   :  { %v260_v13 = vpop.f32.mrf.mxu2 }
  0xf1   :  { %v764_v14 = vpop.eup %763  ;;  %v261_v15 = vadd.f32 %v1018_v0, %v260_v13 }
  0xf2   :  { %549 = vmatmul.f32.gmra.mxu3 %v764_v14  ;;  %v167_v17 = vpop.f32.mrf.mxu0 }
  0xf3   :  { %v766_v19 = vpop.eup %765  ;;  %767 = vtanh.f32 %v261_v15  ;;  %v168_v20 = vadd.f32 %v1018_v0, %v167_v17 }
  0xf4   :  { %456 = vmatmul.f32.gmra.mxu1 %v766_v19 }
  0xf5   :  { %310 = vmatmul.f32.gmra.mxu2 %v94_v16  ;;  %769 = vtanh.f32 %v168_v20  ;;  %214 = vmatmul.f32.gmra.mxu0 %v62_v18 }
  0xf8   :  { %v263_v21 = vpop.f32.mrf.mxu2 }
  0xf9   :  { %v768_v22 = vpop.eup %767  ;;  %v264_v23 = vadd.f32 %v1018_v0, %v263_v21 }
  0xfa   :  { %552 = vmatmul.f32.gmra.mxu3 %v768_v22  ;;  %v170_v25 = vpop.f32.mrf.mxu0 }
  0xfb   :  { %v770_v27 = vpop.eup %769  ;;  %771 = vtanh.f32 %v264_v23  ;;  %v171_v28 = vadd.f32 %v1018_v0, %v170_v25 }
  0xfc   :  { %459 = vmatmul.f32.gmra.mxu1 %v770_v27 }
  0xfd   :  { %313 = vmatmul.f32.gmra.mxu2 %v95_v24  ;;  %773 = vtanh.f32 %v171_v28  ;;  %217 = vmatmul.f32.gmra.mxu0 %v63_v26 }
 0x100   :  { %v266_v29 = vpop.f32.mrf.mxu2 }
 0x101   :  { %v772_v30 = vpop.eup %771  ;;  %v267_v31 = vadd.f32 %v1018_v0, %v266_v29 }
 0x102   :  { %555 = vmatmul.f32.gmra.mxu3 %v772_v30  ;;  %v173_v33 = vpop.f32.mrf.mxu0 }
 0x103   :  { %v774_v35 = vpop.eup %773  ;;  %775 = vtanh.f32 %v267_v31  ;;  %v174_v36 = vadd.f32 %v1018_v0, %v173_v33 }
 0x104   :  { %462 = vmatmul.f32.gmra.mxu1 %v774_v35 }
 0x105   :  { %316 = vmatmul.f32.gmra.mxu2 %v96_v32  ;;  %777 = vtanh.f32 %v174_v36  ;;  %220 = vmatmul.f32.gmra.mxu0 %v64_v34 }
 0x108   :  { %v269_v37 = vpop.f32.mrf.mxu2 }
 0x109   :  { %v776_v38 = vpop.eup %775  ;;  %v270_v39 = vadd.f32 %v1018_v0, %v269_v37 }
 0x10a   :  { %558 = vmatmul.f32.gmra.mxu3 %v776_v38  ;;  %v176_v41 = vpop.f32.mrf.mxu0 }
 0x10b   :  { %v778_v43 = vpop.eup %777  ;;  %779 = vtanh.f32 %v270_v39  ;;  %v177_v44 = vadd.f32 %v1018_v0, %v176_v41 }
 0x10c   :  { %465 = vmatmul.f32.gmra.mxu1 %v778_v43 }
 0x10d   :  { %319 = vmatmul.f32.gmra.mxu2 %v97_v40  ;;  %781 = vtanh.f32 %v177_v44  ;;  %223 = vmatmul.f32.gmra.mxu0 %v65_v42 }
 0x110   :  { %v272_v45 = vpop.f32.mrf.mxu2 }
 0x111   :  { %v780_v46 = vpop.eup %779  ;;  %v273_v47 = vadd.f32 %v1018_v0, %v272_v45 }
 0x112   :  { %561 = vmatmul.f32.gmra.mxu3 %v780_v46  ;;  %v179_v49 = vpop.f32.mrf.mxu0 }
 0x113   :  { %v782_v51 = vpop.eup %781  ;;  %783 = vtanh.f32 %v273_v47  ;;  %v180_v52 = vadd.f32 %v1018_v0, %v179_v49 }
 0x114   :  { %468 = vmatmul.f32.gmra.mxu1 %v782_v51 }
 0x115   :  { %322 = vmatmul.f32.gmra.mxu2 %v98_v48  ;;  %785 = vtanh.f32 %v180_v52  ;;  %226 = vmatmul.f32.gmra.mxu0 %v66_v50 }
 0x118   :  { %v275_v53 = vpop.f32.mrf.mxu2 }
 0x119   :  { %v784_v54 = vpop.eup %783  ;;  %v276_v55 = vadd.f32 %v1018_v0, %v275_v53 }
 0x11a   :  { %564 = vmatmul.f32.gmra.mxu3 %v784_v54  ;;  %v182_v57 = vpop.f32.mrf.mxu0 }
 0x11b   :  { %v786_v59 = vpop.eup %785  ;;  %787 = vtanh.f32 %v276_v55  ;;  %v183_v60 = vadd.f32 %v1018_v0, %v182_v57 }
 0x11c   :  { %471 = vmatmul.f32.gmra.mxu1 %v786_v59 }
 0x11d   :  { %325 = vmatmul.f32.gmra.mxu2 %v99_v56  ;;  %789 = vtanh.f32 %v183_v60  ;;  %229 = vmatmul.f32.gmra.mxu0 %v67_v58 }
 0x120   :  { %v278_v61 = vpop.f32.mrf.mxu2 }
 0x121   :  { %v788_v62 = vpop.eup %787  ;;  %v279_v63 = vadd.f32 %v1018_v0, %v278_v61 }
 0x122   :  { %567 = vmatmul.f32.gmra.mxu3 %v788_v62  ;;  %v185_v1 = vpop.f32.mrf.mxu0 }
 0x123   :  { %v790_v2 = vpop.eup %789  ;;  %791 = vtanh.f32 %v279_v63  ;;  %v186_v3 = vadd.f32 %v1018_v0, %v185_v1 }
 0x124   :  { %474 = vmatmul.f32.gmra.mxu1 %v790_v2 }
 0x125   :  { %793 = vtanh.f32 %v186_v3 }
 0x128   :  { %v281_v5 = vpop.f32.mrf.mxu2 }
 0x129   :  { %v792_v6 = vpop.eup %791  ;;  %v282_v7 = vadd.f32 %v1018_v0, %v281_v5  ;;  %v430_v8 = vpop.f32.mrf.mxu1 }
 0x12a   :  { %570 = vmatmul.f32.gmra.mxu3 %v792_v6  ;;  %v431_v9 = vadd.f32 %v1056_v4, %v430_v8  ;;  %v188_v10 = vpop.f32.mrf.mxu0 }
 0x12b   :  { %v794_v11 = vpop.eup %793  ;;  %795 = vtanh.f32 %v282_v7  ;;  %v189_v12 = vadd.f32 %v1018_v0, %v188_v10 }
 0x12c   :  { %623 = vst.msk [vmem:[%s1414_s5] sm:$0xff] %vm622_vm0, %v431_v9  ;;  %477 = vmatmul.f32.gmra.mxu1 %v794_v11 }
 0x12d   :  { %797 = vtanh.f32 %v189_v12 }
 0x130   :  { %v284_v13 = vpop.f32.mrf.mxu2 }
 0x131   :  { %v796_v14 = vpop.eup %795  ;;  %v285_v15 = vadd.f32 %v1018_v0, %v284_v13  ;;  %v433_v16 = vpop.f32.mrf.mxu1 }
 0x132   :  { %573 = vmatmul.f32.gmra.mxu3 %v796_v14  ;;  %v434_v17 = vadd.f32 %v1056_v4, %v433_v16  ;;  %v191_v18 = vpop.f32.mrf.mxu0 }
 0x133   :  { %v798_v19 = vpop.eup %797  ;;  %799 = vtanh.f32 %v285_v15  ;;  %v192_v20 = vadd.f32 %v1018_v0, %v191_v18 }
 0x134   :  { %624 = vst.msk [vmem:[%s1414_s5 + $0x8] sm:$0xff] %vm622_vm0, %v434_v17  ;;  %480 = vmatmul.f32.gmra.mxu1 %v798_v19 }
 0x135   :  { %v526_v21 = vpop.f32.mrf.mxu3  ;;  %801 = vtanh.f32 %v192_v20 }
 0x136   :  { %v527_v22 = vadd.f32 %v1056_v4, %v526_v21 }
 0x138   :  { %655 = vst.msk [vmem:[%s1414_s5 + $0x100] sm:$0xff] %vm622_vm0, %v527_v22  ;;  %v287_v23 = vpop.f32.mrf.mxu2 }
 0x139   :  { %v800_v24 = vpop.eup %799  ;;  %v288_v25 = vadd.f32 %v1018_v0, %v287_v23  ;;  %v436_v26 = vpop.f32.mrf.mxu1 }
 0x13a   :  { %576 = vmatmul.f32.gmra.mxu3 %v800_v24  ;;  %v437_v27 = vadd.f32 %v1056_v4, %v436_v26  ;;  %v194_v28 = vpop.f32.mrf.mxu0 }
 0x13b   :  { %v802_v29 = vpop.eup %801  ;;  %803 = vtanh.f32 %v288_v25  ;;  %v195_v30 = vadd.f32 %v1018_v0, %v194_v28 }
 0x13c   :  { %625 = vst.msk [vmem:[%s1414_s5 + $0x10] sm:$0xff] %vm622_vm0, %v437_v27  ;;  %483 = vmatmul.f32.gmra.mxu1 %v802_v29 }
 0x13d   :  { %v529_v31 = vpop.f32.mrf.mxu3  ;;  %805 = vtanh.f32 %v195_v30 }
 0x13e   :  { %v530_v32 = vadd.f32 %v1056_v4, %v529_v31 }
 0x140   :  { %656 = vst.msk [vmem:[%s1414_s5 + $0x108] sm:$0xff] %vm622_vm0, %v530_v32  ;;  %v290_v33 = vpop.f32.mrf.mxu2 }
 0x141   :  { %v804_v34 = vpop.eup %803  ;;  %v291_v35 = vadd.f32 %v1018_v0, %v290_v33  ;;  %v439_v36 = vpop.f32.mrf.mxu1 }
 0x142   :  { %579 = vmatmul.f32.gmra.mxu3 %v804_v34  ;;  %v440_v37 = vadd.f32 %v1056_v4, %v439_v36  ;;  %v197_v38 = vpop.f32.mrf.mxu0 }
 0x143   :  { %v806_v39 = vpop.eup %805  ;;  %807 = vtanh.f32 %v291_v35  ;;  %v198_v40 = vadd.f32 %v1018_v0, %v197_v38 }
 0x144   :  { %626 = vst.msk [vmem:[%s1414_s5 + $0x18] sm:$0xff] %vm622_vm0, %v440_v37  ;;  %486 = vmatmul.f32.gmra.mxu1 %v806_v39 }
 0x145   :  { %v532_v41 = vpop.f32.mrf.mxu3  ;;  %809 = vtanh.f32 %v198_v40 }
 0x146   :  { %v533_v42 = vadd.f32 %v1056_v4, %v532_v41 }
 0x148   :  { %657 = vst.msk [vmem:[%s1414_s5 + $0x110] sm:$0xff] %vm622_vm0, %v533_v42  ;;  %v293_v43 = vpop.f32.mrf.mxu2 }
 0x149   :  { %v808_v44 = vpop.eup %807  ;;  %v294_v45 = vadd.f32 %v1018_v0, %v293_v43  ;;  %v442_v46 = vpop.f32.mrf.mxu1 }
 0x14a   :  { %582 = vmatmul.f32.gmra.mxu3 %v808_v44  ;;  %v443_v47 = vadd.f32 %v1056_v4, %v442_v46  ;;  %v200_v48 = vpop.f32.mrf.mxu0 }
 0x14b   :  { %v810_v49 = vpop.eup %809  ;;  %811 = vtanh.f32 %v294_v45  ;;  %v201_v50 = vadd.f32 %v1018_v0, %v200_v48 }
 0x14c   :  { %627 = vst.msk [vmem:[%s1414_s5 + $0x20] sm:$0xff] %vm622_vm0, %v443_v47  ;;  %489 = vmatmul.f32.gmra.mxu1 %v810_v49 }
 0x14d   :  { %v535_v51 = vpop.f32.mrf.mxu3  ;;  %813 = vtanh.f32 %v201_v50 }
 0x14e   :  { %v536_v52 = vadd.f32 %v1056_v4, %v535_v51 }
 0x150   :  { %658 = vst.msk [vmem:[%s1414_s5 + $0x118] sm:$0xff] %vm622_vm0, %v536_v52  ;;  %v296_v53 = vpop.f32.mrf.mxu2 }
 0x151   :  { %v812_v54 = vpop.eup %811  ;;  %v297_v55 = vadd.f32 %v1018_v0, %v296_v53  ;;  %v445_v56 = vpop.f32.mrf.mxu1 }
 0x152   :  { %585 = vmatmul.f32.gmra.mxu3 %v812_v54  ;;  %v446_v57 = vadd.f32 %v1056_v4, %v445_v56  ;;  %v203_v58 = vpop.f32.mrf.mxu0 }
 0x153   :  { %v814_v59 = vpop.eup %813  ;;  %815 = vtanh.f32 %v297_v55  ;;  %v204_v60 = vadd.f32 %v1018_v0, %v203_v58 }
 0x154   :  { %628 = vst.msk [vmem:[%s1414_s5 + $0x28] sm:$0xff] %vm622_vm0, %v446_v57  ;;  %492 = vmatmul.f32.gmra.mxu1 %v814_v59 }
 0x155   :  { %v538_v61 = vpop.f32.mrf.mxu3  ;;  %817 = vtanh.f32 %v204_v60 }
 0x156   :  { %v539_v62 = vadd.f32 %v1056_v4, %v538_v61 }
 0x158   :  { %659 = vst.msk [vmem:[%s1414_s5 + $0x120] sm:$0xff] %vm622_vm0, %v539_v62  ;;  %v299_v63 = vpop.f32.mrf.mxu2 }
 0x159   :  { %v816_v1 = vpop.eup %815  ;;  %v300_v2 = vadd.f32 %v1018_v0, %v299_v63  ;;  %v448_v3 = vpop.f32.mrf.mxu1 }
 0x15a   :  { %588 = vmatmul.f32.gmra.mxu3 %v816_v1  ;;  %v449_v5 = vadd.f32 %v1056_v4, %v448_v3  ;;  %v206_v6 = vpop.f32.mrf.mxu0 }
 0x15b   :  { %v818_v7 = vpop.eup %817  ;;  %819 = vtanh.f32 %v300_v2  ;;  %v207_v8 = vadd.f32 %v1018_v0, %v206_v6 }
 0x15c   :  { %629 = vst.msk [vmem:[%s1414_s5 + $0x30] sm:$0xff] %vm622_vm0, %v449_v5  ;;  %495 = vmatmul.f32.gmra.mxu1 %v818_v7 }
 0x15d   :  { %v541_v9 = vpop.f32.mrf.mxu3  ;;  %821 = vtanh.f32 %v207_v8 }
 0x15e   :  { %v542_v10 = vadd.f32 %v1056_v4, %v541_v9 }
 0x160   :  { %660 = vst.msk [vmem:[%s1414_s5 + $0x128] sm:$0xff] %vm622_vm0, %v542_v10  ;;  %v302_v11 = vpop.f32.mrf.mxu2 }
 0x161   :  { %v820_v12 = vpop.eup %819  ;;  %v303_v13 = vadd.f32 %v1018_v0, %v302_v11  ;;  %v451_v14 = vpop.f32.mrf.mxu1 }
 0x162   :  { %591 = vmatmul.f32.gmra.mxu3 %v820_v12  ;;  %v452_v15 = vadd.f32 %v1056_v4, %v451_v14  ;;  %v209_v16 = vpop.f32.mrf.mxu0 }
 0x163   :  { %v822_v17 = vpop.eup %821  ;;  %823 = vtanh.f32 %v303_v13  ;;  %v210_v18 = vadd.f32 %v1018_v0, %v209_v16 }
 0x164   :  { %630 = vst.msk [vmem:[%s1414_s5 + $0x38] sm:$0xff] %vm622_vm0, %v452_v15  ;;  %498 = vmatmul.f32.gmra.mxu1 %v822_v17 }
 0x165   :  { %v544_v19 = vpop.f32.mrf.mxu3  ;;  %825 = vtanh.f32 %v210_v18 }
 0x166   :  { %v545_v20 = vadd.f32 %v1056_v4, %v544_v19 }
 0x168   :  { %661 = vst.msk [vmem:[%s1414_s5 + $0x130] sm:$0xff] %vm622_vm0, %v545_v20  ;;  %v305_v21 = vpop.f32.mrf.mxu2 }
 0x169   :  { %v824_v22 = vpop.eup %823  ;;  %v306_v23 = vadd.f32 %v1018_v0, %v305_v21  ;;  %v454_v24 = vpop.f32.mrf.mxu1 }
 0x16a   :  { %594 = vmatmul.f32.gmra.mxu3 %v824_v22  ;;  %v455_v25 = vadd.f32 %v1056_v4, %v454_v24  ;;  %v212_v26 = vpop.f32.mrf.mxu0 }
 0x16b   :  { %v826_v27 = vpop.eup %825  ;;  %827 = vtanh.f32 %v306_v23  ;;  %v213_v28 = vadd.f32 %v1018_v0, %v212_v26 }
 0x16c   :  { %631 = vst.msk [vmem:[%s1414_s5 + $0x40] sm:$0xff] %vm622_vm0, %v455_v25  ;;  %501 = vmatmul.f32.gmra.mxu1 %v826_v27 }
 0x16d   :  { %v547_v29 = vpop.f32.mrf.mxu3  ;;  %829 = vtanh.f32 %v213_v28 }
 0x16e   :  { %v548_v30 = vadd.f32 %v1056_v4, %v547_v29 }
 0x170   :  { %662 = vst.msk [vmem:[%s1414_s5 + $0x138] sm:$0xff] %vm622_vm0, %v548_v30  ;;  %v308_v31 = vpop.f32.mrf.mxu2 }
 0x171   :  { %v828_v32 = vpop.eup %827  ;;  %v309_v33 = vadd.f32 %v1018_v0, %v308_v31  ;;  %v457_v34 = vpop.f32.mrf.mxu1 }
 0x172   :  { %597 = vmatmul.f32.gmra.mxu3 %v828_v32  ;;  %v458_v35 = vadd.f32 %v1056_v4, %v457_v34  ;;  %v215_v36 = vpop.f32.mrf.mxu0 }
 0x173   :  { %v830_v37 = vpop.eup %829  ;;  %831 = vtanh.f32 %v309_v33  ;;  %v216_v38 = vadd.f32 %v1018_v0, %v215_v36 }
 0x174   :  { %632 = vst.msk [vmem:[%s1414_s5 + $0x48] sm:$0xff] %vm622_vm0, %v458_v35  ;;  %504 = vmatmul.f32.gmra.mxu1 %v830_v37 }
 0x175   :  { %v550_v39 = vpop.f32.mrf.mxu3  ;;  %833 = vtanh.f32 %v216_v38 }
 0x176   :  { %v551_v40 = vadd.f32 %v1056_v4, %v550_v39 }
 0x178   :  { %663 = vst.msk [vmem:[%s1414_s5 + $0x140] sm:$0xff] %vm622_vm0, %v551_v40  ;;  %v311_v41 = vpop.f32.mrf.mxu2 }
 0x179   :  { %v832_v42 = vpop.eup %831  ;;  %v312_v43 = vadd.f32 %v1018_v0, %v311_v41  ;;  %v460_v44 = vpop.f32.mrf.mxu1 }
 0x17a   :  { %600 = vmatmul.f32.gmra.mxu3 %v832_v42  ;;  %v461_v45 = vadd.f32 %v1056_v4, %v460_v44  ;;  %v218_v46 = vpop.f32.mrf.mxu0 }
 0x17b   :  { %v834_v47 = vpop.eup %833  ;;  %835 = vtanh.f32 %v312_v43  ;;  %v219_v48 = vadd.f32 %v1018_v0, %v218_v46 }
 0x17c   :  { %633 = vst.msk [vmem:[%s1414_s5 + $0x50] sm:$0xff] %vm622_vm0, %v461_v45  ;;  %507 = vmatmul.f32.gmra.mxu1 %v834_v47 }
 0x17d   :  { %v553_v49 = vpop.f32.mrf.mxu3  ;;  %837 = vtanh.f32 %v219_v48 }
 0x17e   :  { %v554_v50 = vadd.f32 %v1056_v4, %v553_v49 }
 0x180   :  { %664 = vst.msk [vmem:[%s1414_s5 + $0x148] sm:$0xff] %vm622_vm0, %v554_v50  ;;  %v314_v51 = vpop.f32.mrf.mxu2 }
 0x181   :  { %v836_v52 = vpop.eup %835  ;;  %v315_v53 = vadd.f32 %v1018_v0, %v314_v51  ;;  %v463_v54 = vpop.f32.mrf.mxu1 }
 0x182   :  { %603 = vmatmul.f32.gmra.mxu3 %v836_v52  ;;  %v464_v55 = vadd.f32 %v1056_v4, %v463_v54  ;;  %v221_v56 = vpop.f32.mrf.mxu0 }
 0x183   :  { %v838_v57 = vpop.eup %837  ;;  %839 = vtanh.f32 %v315_v53  ;;  %v222_v58 = vadd.f32 %v1018_v0, %v221_v56 }
 0x184   :  { %634 = vst.msk [vmem:[%s1414_s5 + $0x58] sm:$0xff] %vm622_vm0, %v464_v55  ;;  %510 = vmatmul.f32.gmra.mxu1 %v838_v57 }
 0x185   :  { %v556_v59 = vpop.f32.mrf.mxu3  ;;  %841 = vtanh.f32 %v222_v58 }
 0x186   :  { %v557_v60 = vadd.f32 %v1056_v4, %v556_v59 }
 0x188   :  { %665 = vst.msk [vmem:[%s1414_s5 + $0x150] sm:$0xff] %vm622_vm0, %v557_v60  ;;  %v317_v61 = vpop.f32.mrf.mxu2 }
 0x189   :  { %v840_v62 = vpop.eup %839  ;;  %v318_v63 = vadd.f32 %v1018_v0, %v317_v61  ;;  %v466_v1 = vpop.f32.mrf.mxu1 }
 0x18a   :  { %606 = vmatmul.f32.gmra.mxu3 %v840_v62  ;;  %v467_v2 = vadd.f32 %v1056_v4, %v466_v1  ;;  %v224_v3 = vpop.f32.mrf.mxu0 }
 0x18b   :  { %v842_v5 = vpop.eup %841  ;;  %843 = vtanh.f32 %v318_v63  ;;  %v225_v6 = vadd.f32 %v1018_v0, %v224_v3 }
 0x18c   :  { %635 = vst.msk [vmem:[%s1414_s5 + $0x60] sm:$0xff] %vm622_vm0, %v467_v2  ;;  %513 = vmatmul.f32.gmra.mxu1 %v842_v5 }
 0x18d   :  { %v559_v7 = vpop.f32.mrf.mxu3  ;;  %845 = vtanh.f32 %v225_v6 }
 0x18e   :  { %v560_v8 = vadd.f32 %v1056_v4, %v559_v7 }
 0x190   :  { %666 = vst.msk [vmem:[%s1414_s5 + $0x158] sm:$0xff] %vm622_vm0, %v560_v8  ;;  %v320_v9 = vpop.f32.mrf.mxu2 }
 0x191   :  { %v844_v10 = vpop.eup %843  ;;  %v321_v11 = vadd.f32 %v1018_v0, %v320_v9  ;;  %v469_v12 = vpop.f32.mrf.mxu1 }
 0x192   :  { %609 = vmatmul.f32.gmra.mxu3 %v844_v10  ;;  %v470_v13 = vadd.f32 %v1056_v4, %v469_v12  ;;  %v227_v14 = vpop.f32.mrf.mxu0 }
 0x193   :  { %v846_v15 = vpop.eup %845  ;;  %847 = vtanh.f32 %v321_v11  ;;  %v228_v16 = vadd.f32 %v1018_v0, %v227_v14 }
 0x194   :  { %636 = vst.msk [vmem:[%s1414_s5 + $0x68] sm:$0xff] %vm622_vm0, %v470_v13  ;;  %516 = vmatmul.f32.gmra.mxu1 %v846_v15 }
 0x195   :  { %v562_v17 = vpop.f32.mrf.mxu3  ;;  %849 = vtanh.f32 %v228_v16 }
 0x196   :  { %v563_v18 = vadd.f32 %v1056_v4, %v562_v17 }
 0x198   :  { %667 = vst.msk [vmem:[%s1414_s5 + $0x160] sm:$0xff] %vm622_vm0, %v563_v18  ;;  %v323_v19 = vpop.f32.mrf.mxu2 }
 0x199   :  { %v848_v20 = vpop.eup %847  ;;  %v324_v21 = vadd.f32 %v1018_v0, %v323_v19  ;;  %v472_v22 = vpop.f32.mrf.mxu1 }
 0x19a   :  { %612 = vmatmul.f32.gmra.mxu3 %v848_v20  ;;  %v473_v23 = vadd.f32 %v1056_v4, %v472_v22  ;;  %v230_v24 = vpop.f32.mrf.mxu0 }
 0x19b   :  { %v850_v25 = vpop.eup %849  ;;  %851 = vtanh.f32 %v324_v21  ;;  %v231_v26 = vadd.f32 %v1018_v0, %v230_v24 }
 0x19c   :  { %637 = vst.msk [vmem:[%s1414_s5 + $0x70] sm:$0xff] %vm622_vm0, %v473_v23  ;;  %519 = vmatmul.f32.gmra.mxu1 %v850_v25 }
 0x19d   :  { %v565_v27 = vpop.f32.mrf.mxu3  ;;  %853 = vtanh.f32 %v231_v26 }
 0x19e   :  { %v566_v28 = vadd.f32 %v1056_v4, %v565_v27 }
 0x1a0   :  { %668 = vst.msk [vmem:[%s1414_s5 + $0x168] sm:$0xff] %vm622_vm0, %v566_v28  ;;  %v326_v29 = vpop.f32.mrf.mxu2 }
 0x1a1   :  { %v852_v30 = vpop.eup %851  ;;  %v327_v31 = vadd.f32 %v1018_v0, %v326_v29  ;;  %v475_v32 = vpop.f32.mrf.mxu1 }
 0x1a2   :  { %615 = vmatmul.f32.gmra.mxu3 %v852_v30  ;;  %v476_v33 = vadd.f32 %v1056_v4, %v475_v32 }
 0x1a3   :  { %v854_v34 = vpop.eup %853  ;;  %855 = vtanh.f32 %v327_v31 }
 0x1a4   :  { %638 = vst.msk [vmem:[%s1414_s5 + $0x78] sm:$0xff] %vm622_vm0, %v476_v33  ;;  %522 = vmatmul.f32.gmra.mxu1 %v854_v34 }
 0x1a5   :  { %v568_v35 = vpop.f32.mrf.mxu3 }
 0x1a6   :  { %v569_v36 = vadd.f32 %v1056_v4, %v568_v35 }
 0x1a8   :  { %669 = vst.msk [vmem:[%s1414_s5 + $0x170] sm:$0xff] %vm622_vm0, %v569_v36 }
 0x1a9   :  { %v856_v0 = vpop.eup %855  ;;  %v478_v37 = vpop.f32.mrf.mxu1 }
 0x1aa   :  { %618 = vmatmul.f32.gmra.mxu3 %v856_v0  ;;  %v479_v38 = vadd.f32 %v1056_v4, %v478_v37 }
 0x1ac   :  { %639 = vst.msk [vmem:[%s1414_s5 + $0x80] sm:$0xff] %vm622_vm0, %v479_v38 }
 0x1ad   :  { %v571_v39 = vpop.f32.mrf.mxu3 }
 0x1ae   :  { %v572_v40 = vadd.f32 %v1056_v4, %v571_v39 }
 0x1b0   :  { %670 = vst.msk [vmem:[%s1414_s5 + $0x178] sm:$0xff] %vm622_vm0, %v572_v40 }
 0x1b1   :  { %v481_v41 = vpop.f32.mrf.mxu1 }
 0x1b2   :  { %v482_v42 = vadd.f32 %v1056_v4, %v481_v41 }
 0x1b4   :  { %640 = vst.msk [vmem:[%s1414_s5 + $0x88] sm:$0xff] %vm622_vm0, %v482_v42 }
 0x1b5   :  { %v574_v43 = vpop.f32.mrf.mxu3 }
 0x1b6   :  { %v575_v44 = vadd.f32 %v1056_v4, %v574_v43 }
 0x1b8   :  { %671 = vst.msk [vmem:[%s1414_s5 + $0x180] sm:$0xff] %vm622_vm0, %v575_v44 }
 0x1b9   :  { %v484_v45 = vpop.f32.mrf.mxu1 }
 0x1ba   :  { %v485_v46 = vadd.f32 %v1056_v4, %v484_v45 }
 0x1bc   :  { %641 = vst.msk [vmem:[%s1414_s5 + $0x90] sm:$0xff] %vm622_vm0, %v485_v46 }
 0x1bd   :  { %v577_v47 = vpop.f32.mrf.mxu3 }
 0x1be   :  { %v578_v48 = vadd.f32 %v1056_v4, %v577_v47 }
 0x1c0   :  { %672 = vst.msk [vmem:[%s1414_s5 + $0x188] sm:$0xff] %vm622_vm0, %v578_v48 }
 0x1c1   :  { %v487_v49 = vpop.f32.mrf.mxu1 }
 0x1c2   :  { %v488_v50 = vadd.f32 %v1056_v4, %v487_v49 }
 0x1c4   :  { %642 = vst.msk [vmem:[%s1414_s5 + $0x98] sm:$0xff] %vm622_vm0, %v488_v50 }
 0x1c5   :  { %v580_v51 = vpop.f32.mrf.mxu3 }
 0x1c6   :  { %v581_v52 = vadd.f32 %v1056_v4, %v580_v51 }
 0x1c8   :  { %673 = vst.msk [vmem:[%s1414_s5 + $0x190] sm:$0xff] %vm622_vm0, %v581_v52 }
 0x1c9   :  { %v490_v53 = vpop.f32.mrf.mxu1 }
 0x1ca   :  { %v491_v54 = vadd.f32 %v1056_v4, %v490_v53 }
 0x1cc   :  { %643 = vst.msk [vmem:[%s1414_s5 + $0xa0] sm:$0xff] %vm622_vm0, %v491_v54 }
 0x1cd   :  { %v583_v55 = vpop.f32.mrf.mxu3 }
 0x1ce   :  { %v584_v56 = vadd.f32 %v1056_v4, %v583_v55 }
 0x1d0   :  { %674 = vst.msk [vmem:[%s1414_s5 + $0x198] sm:$0xff] %vm622_vm0, %v584_v56 }
 0x1d1   :  { %v493_v57 = vpop.f32.mrf.mxu1 }
 0x1d2   :  { %v494_v58 = vadd.f32 %v1056_v4, %v493_v57 }
 0x1d4   :  { %644 = vst.msk [vmem:[%s1414_s5 + $0xa8] sm:$0xff] %vm622_vm0, %v494_v58 }
 0x1d5   :  { %v586_v59 = vpop.f32.mrf.mxu3 }
 0x1d6   :  { %v587_v60 = vadd.f32 %v1056_v4, %v586_v59 }
 0x1d8   :  { %675 = vst.msk [vmem:[%s1414_s5 + $0x1a0] sm:$0xff] %vm622_vm0, %v587_v60 }
 0x1d9   :  { %v496_v61 = vpop.f32.mrf.mxu1 }
 0x1da   :  { %v497_v62 = vadd.f32 %v1056_v4, %v496_v61 }
 0x1dc   :  { %645 = vst.msk [vmem:[%s1414_s5 + $0xb0] sm:$0xff] %vm622_vm0, %v497_v62 }
 0x1dd   :  { %v589_v63 = vpop.f32.mrf.mxu3 }
 0x1de   :  { %v590_v1 = vadd.f32 %v1056_v4, %v589_v63 }
 0x1e0   :  { %676 = vst.msk [vmem:[%s1414_s5 + $0x1a8] sm:$0xff] %vm622_vm0, %v590_v1 }
 0x1e1   :  { %v499_v2 = vpop.f32.mrf.mxu1 }
 0x1e2   :  { %v500_v3 = vadd.f32 %v1056_v4, %v499_v2 }
 0x1e4   :  { %646 = vst.msk [vmem:[%s1414_s5 + $0xb8] sm:$0xff] %vm622_vm0, %v500_v3 }
 0x1e5   :  { %v592_v5 = vpop.f32.mrf.mxu3 }
 0x1e6   :  { %v593_v6 = vadd.f32 %v1056_v4, %v592_v5 }
 0x1e8   :  { %677 = vst.msk [vmem:[%s1414_s5 + $0x1b0] sm:$0xff] %vm622_vm0, %v593_v6 }
 0x1e9   :  { %v502_v7 = vpop.f32.mrf.mxu1 }
 0x1ea   :  { %v503_v8 = vadd.f32 %v1056_v4, %v502_v7 }
 0x1ec   :  { %647 = vst.msk [vmem:[%s1414_s5 + $0xc0] sm:$0xff] %vm622_vm0, %v503_v8 }
 0x1ed   :  { %v595_v9 = vpop.f32.mrf.mxu3 }
 0x1ee   :  { %v596_v10 = vadd.f32 %v1056_v4, %v595_v9 }
 0x1f0   :  { %678 = vst.msk [vmem:[%s1414_s5 + $0x1b8] sm:$0xff] %vm622_vm0, %v596_v10 }
 0x1f1   :  { %v505_v11 = vpop.f32.mrf.mxu1 }
 0x1f2   :  { %v506_v12 = vadd.f32 %v1056_v4, %v505_v11 }
 0x1f4   :  { %648 = vst.msk [vmem:[%s1414_s5 + $0xc8] sm:$0xff] %vm622_vm0, %v506_v12 }
 0x1f5   :  { %v598_v13 = vpop.f32.mrf.mxu3 }
 0x1f6   :  { %v599_v14 = vadd.f32 %v1056_v4, %v598_v13 }
 0x1f8   :  { %679 = vst.msk [vmem:[%s1414_s5 + $0x1c0] sm:$0xff] %vm622_vm0, %v599_v14 }
 0x1f9   :  { %v508_v15 = vpop.f32.mrf.mxu1 }
 0x1fa   :  { %v509_v16 = vadd.f32 %v1056_v4, %v508_v15 }
 0x1fc   :  { %649 = vst.msk [vmem:[%s1414_s5 + $0xd0] sm:$0xff] %vm622_vm0, %v509_v16 }
 0x1fd   :  { %v601_v17 = vpop.f32.mrf.mxu3 }
 0x1fe   :  { %v602_v18 = vadd.f32 %v1056_v4, %v601_v17 }
 0x200   :  { %680 = vst.msk [vmem:[%s1414_s5 + $0x1c8] sm:$0xff] %vm622_vm0, %v602_v18 }
 0x201   :  { %v511_v19 = vpop.f32.mrf.mxu1 }
 0x202   :  { %v512_v20 = vadd.f32 %v1056_v4, %v511_v19 }
 0x204   :  { %650 = vst.msk [vmem:[%s1414_s5 + $0xd8] sm:$0xff] %vm622_vm0, %v512_v20 }
 0x205   :  { %v604_v21 = vpop.f32.mrf.mxu3 }
 0x206   :  { %v605_v22 = vadd.f32 %v1056_v4, %v604_v21 }
 0x208   :  { %681 = vst.msk [vmem:[%s1414_s5 + $0x1d0] sm:$0xff] %vm622_vm0, %v605_v22 }
 0x209   :  { %v514_v23 = vpop.f32.mrf.mxu1 }
 0x20a   :  { %v515_v24 = vadd.f32 %v1056_v4, %v514_v23 }
 0x20c   :  { %651 = vst.msk [vmem:[%s1414_s5 + $0xe0] sm:$0xff] %vm622_vm0, %v515_v24 }
 0x20d   :  { %v607_v25 = vpop.f32.mrf.mxu3 }
 0x20e   :  { %v608_v26 = vadd.f32 %v1056_v4, %v607_v25 }
 0x210   :  { %682 = vst.msk [vmem:[%s1414_s5 + $0x1d8] sm:$0xff] %vm622_vm0, %v608_v26 }
 0x211   :  { %v517_v27 = vpop.f32.mrf.mxu1 }
 0x212   :  { %v518_v28 = vadd.f32 %v1056_v4, %v517_v27 }
 0x214   :  { %652 = vst.msk [vmem:[%s1414_s5 + $0xe8] sm:$0xff] %vm622_vm0, %v518_v28 }
 0x215   :  { %v610_v29 = vpop.f32.mrf.mxu3 }
 0x216   :  { %v611_v30 = vadd.f32 %v1056_v4, %v610_v29 }
 0x218   :  { %683 = vst.msk [vmem:[%s1414_s5 + $0x1e0] sm:$0xff] %vm622_vm0, %v611_v30 }
 0x219   :  { %v520_v31 = vpop.f32.mrf.mxu1 }
 0x21a   :  { %v521_v32 = vadd.f32 %v1056_v4, %v520_v31 }
 0x21c   :  { %653 = vst.msk [vmem:[%s1414_s5 + $0xf0] sm:$0xff] %vm622_vm0, %v521_v32 }
 0x21d   :  { %v613_v33 = vpop.f32.mrf.mxu3 }
 0x21e   :  { %v614_v34 = vadd.f32 %v1056_v4, %v613_v33 }
 0x220   :  { %684 = vst.msk [vmem:[%s1414_s5 + $0x1e8] sm:$0xff] %vm622_vm0, %v614_v34 }
 0x221   :  { %v523_v35 = vpop.f32.mrf.mxu1 }
 0x222   :  { %v524_v36 = vadd.f32 %v1056_v4, %v523_v35 }
 0x224   :  { %654 = vst.msk [vmem:[%s1414_s5 + $0xf8] sm:$0xff] %vm622_vm0, %v524_v36 }
 0x225   :  { %v616_v0 = vpop.f32.mrf.mxu3 }
 0x226   :  { %v617_v37 = vadd.f32 %v1056_v4, %v616_v0 }
 0x228   :  { %685 = vst.msk [vmem:[%s1414_s5 + $0x1f0] sm:$0xff] %vm622_vm0, %v617_v37 }
 0x22d   :  { %v619_v38 = vpop.f32.mrf.mxu3 }
 0x22e   :  { %v620_v39 = vadd.f32 %v1056_v4, %v619_v38 }
 0x230   :  { %686 = vst.msk [vmem:[%s1414_s5 + $0x1f8] sm:$0xff] %vm622_vm0, %v620_v39 }
 0x231   :  { %691 = vsyncpa [#allocation3], 1 }

</bundles_post_ra>
